<compile_context>
chip_gen: v5e
topology: v5e:2x2
jax: 0.10.0
libtpu: 0.0.40
codegen_flags: <defaults>
</compile_context>

<pallas_src>
import functools

import jax
import jax.numpy as jnp
from jax.experimental import pallas as pl
from jax.experimental.pallas import tpu as pltpu

_LANE = 128
_ACC_ROWS = 64                    # accumulator rows (8 vregs -> 8 indep. chains)
_MAX_BLOCK_ROWS = 8192            # (8192, 128) f32 block = 4 MiB per input
_VMEM_LIMIT_BYTES = 32 * 1024 * 1024   # safe scoped-VMEM limit on v5e/v6e/v7x


def _round_up(a: int, b: int) -> int:
    return ((a + b - 1) // b) * b


def _default_num_cores() -> int:
    """Size of the 'parallel' grid axis: >1 only on multi-TensorCore chips."""
    try:
        kind = jax.devices()[0].device_kind.lower()
    except Exception:
        return 2
    # Single-TensorCore (per JAX device) generations.
    for tag in ("v2", "v3", "v5e", "v5 lite", "v5lite", "v6"):
        if tag in kind:
            return 1
    return 2  # v4 / v5p megacore, v7x dual-TC, unknown future chips


def _an_bce_sum(x, t, epsilon):
    """Plain-JAX assume-negative BCE sum (only the <128-element tail)."""
    x = x.astype(jnp.float32)
    z = jnp.where(t == 1, x, -x)
    y = jnp.float32(1.0 - epsilon)
    return jnp.sum(jnp.maximum(z, 0.0) - z * y + jnp.log1p(jnp.exp(-jnp.abs(z))))


def _an_loss_kernel(x_ref, t_ref, out_ref, *, epsilon, n_rows, block_rows,
                    blocks_per_core, need_mask):
    c = pl.program_id(0)
    j = pl.program_id(1)

    @pl.when(j == 0)
    def _():
        out_ref[...] = jnp.zeros_like(out_ref)

    y = jnp.float32(1.0 - epsilon)

    def block_loss():
        x = x_ref[...].astype(jnp.float32)
        pos = t_ref[...] == 1
        xn = -x
        # z = +-x  =>  |z| == |x|  =>  -|z| = min(x, -x): no abs / extra negate.
        softplus = jnp.log1p(jnp.exp(jnp.minimum(x, xn)))
        if epsilon == 0.0:
            # max(z,0) - z == max(-z,0); compute -z directly with one select.
            mz = jnp.where(pos, xn, x)
            return jnp.maximum(mz, 0.0) + softplus
        z = jnp.where(pos, x, xn)
        return jnp.maximum(z, 0.0) - z * y + softplus

    def accumulate(loss):
        # Fold (block_rows, 128) into the resident (1, 64, 128) output block
        # with pure VPU adds; 8 independent accumulator vregs.
        folded = loss.reshape(-1, _ACC_ROWS, _LANE).sum(axis=0)
        out_ref[...] += folded.reshape(1, _ACC_ROWS, _LANE)

    if not need_mask:
        accumulate(block_loss())
    else:
        row0 = (c * blocks_per_core + j) * block_rows

        # Fully interior block: no mask ops at all.
        @pl.when(row0 + block_rows <= n_rows)
        def _():
            accumulate(block_loss())

        # Boundary block (only one per call): mask the padded tail rows with a
        # select so garbage/NaN in the out-of-range region cannot leak in.
        @pl.when(jnp.logical_and(row0 < n_rows, row0 + block_rows > n_rows))
        def _():
            loss = block_loss()
            rows = jax.lax.broadcasted_iota(
                jnp.int32, (block_rows, _LANE), 0) + row0
            accumulate(jnp.where(rows < n_rows, loss, 0.0))

        # row0 >= n_rows: clamped duplicate block on a spare core -> skipped.


def an_loss(x, target, epsilon: float = 0.0, reduction: str = "mean",
            max_block_rows: int = _MAX_BLOCK_ROWS):
    assert reduction in ("sum", "mean")
    assert 0.0 <= epsilon <= 1.0
    assert x.shape == target.shape

    numel = x.size
    xf = x.reshape(-1)        # free for contiguous inputs (no pad, no copy)
    tf = target.reshape(-1)   # keep target in its native dtype (int8 = 1 B/elem)

    n_rows = numel // _LANE
    rem = numel - n_rows * _LANE

    loss_sum = jnp.float32(0.0)

    if n_rows > 0:
        bulk = n_rows * _LANE
        if rem:
            # TODO(synk): ragged numel (not a multiple of 128) pays one XLA
            # copy of the bulk here; avoiding it would need 1-D block streaming.
            x_bulk, t_bulk = xf[:bulk], tf[:bulk]
        else:
            x_bulk, t_bulk = xf, tf
        x2 = x_bulk.reshape(n_rows, _LANE)
        t2 = t_bulk.reshape(n_rows, _LANE)

        # Block rows: multiple of _ACC_ROWS (=64, valid sublane tile for
        # f32/bf16/int8), capped at max_block_rows.
        cap = max(_ACC_ROWS, (int(max_block_rows) // _ACC_ROWS) * _ACC_ROWS)
        block_rows = min(cap, _round_up(n_rows, _ACC_ROWS))
        total_blocks = pl.cdiv(n_rows, block_rows)
        num_cores = max(1, min(_default_num_cores(), total_blocks))
        blocks_per_core = pl.cdiv(total_blocks, num_cores)
        need_mask = (total_blocks * block_rows != n_rows) or (
            blocks_per_core * num_cores != total_blocks)

        def in_index_map(c, j):
            # Clamp: cores whose logical block runs past the end re-read the
            # last valid block; the in-kernel pl.when guard skips its compute.
            return (jnp.minimum(c * blocks_per_core + j, total_blocks - 1), 0)

        tile_spec = pl.BlockSpec((block_rows, _LANE), in_index_map)

        partials = pl.pallas_call(
            functools.partial(
                _an_loss_kernel, epsilon=float(epsilon), n_rows=n_rows,
                block_rows=block_rows, blocks_per_core=blocks_per_core,
                need_mask=need_mask),
            out_shape=jax.ShapeDtypeStruct(
                (num_cores, _ACC_ROWS, _LANE), jnp.float32),
            grid_spec=pltpu.PrefetchScalarGridSpec(
                num_scalar_prefetch=0,
                grid=(num_cores, blocks_per_core),
                in_specs=[tile_spec, tile_spec],
                out_specs=pl.BlockSpec((1, _ACC_ROWS, _LANE),
                                       lambda c, j: (c, 0, 0))),
            compiler_params=pltpu.CompilerParams(
                dimension_semantics=("parallel", "arbitrary"),
                vmem_limit_bytes=_VMEM_LIMIT_BYTES),
        )(x2, t2)

        loss_sum = loss_sum + jnp.sum(partials)

    if rem:
        # Tiny (<128 element) remainder handled in plain JAX.
        loss_sum = loss_sum + _an_bce_sum(xf[n_rows * _LANE:],
                                          tf[n_rows * _LANE:], epsilon)

    if reduction == "sum":
        return loss_sum
    return loss_sum / jnp.float32(numel)


def _an_loss_ref(x, target, epsilon, reduction):
    # Pure-JAX reference mirroring the PyTorch module.
    x = x.astype(jnp.float32)
    t = target.astype(jnp.float32)
    z = jnp.where(t == 1.0, x, -x)
    y = 1.0 - epsilon
    loss = jnp.maximum(z, 0.0) - z * y + jnp.log1p(jnp.exp(-jnp.abs(z)))
    s = jnp.sum(loss)
    return s if reduction == "sum" else s / x.size


if __name__ == "__main__":
    key = jax.random.PRNGKey(0)

    def check(xv, tv_f32, tv_kernel, eps, red, **kw):
        got = jax.block_until_ready(an_loss(xv, tv_kernel, eps, red, **kw))
        want = _an_loss_ref(xv, tv_f32, eps, red)
        assert jnp.allclose(got, want, rtol=1e-5, atol=1e-5), (got, want)

    # 1) Standard NCHW prediction map (2048 elements, 128-aligned), f32 and
    #    int8 target variants, eps in {0.1, 0.0} (exercises both kernel paths).
    kx, kt = jax.random.split(key)
    x = jax.random.normal(kx, (2, 4, 16, 16), dtype=jnp.float32)
    t_f32 = (jax.random.uniform(kt, (2, 4, 16, 16)) > 0.7).astype(jnp.float32)
    t_i8 = t_f32.astype(jnp.int8)
    for tgt in (t_f32, t_i8):
        for eps in (0.1, 0.0):
            for red in ("mean", "sum"):
                check(x, t_f32, tgt, eps, red)

    # 2) Block-aligned shape (n_rows multiple of 64): no-mask fast path.
    kx1, kt1 = jax.random.split(jax.random.PRNGKey(2))
    x1 = jax.random.normal(kx1, (64, 128), dtype=jnp.float32)
    t1 = (jax.random.uniform(kt1, (64, 128)) > 0.5).astype(jnp.float32)
    check(x1, t1, t1, 0.1, "mean")

    # 3) Multi-block + multi-core + boundary-block path (small max_block_rows
    #    keeps the test array tiny while exercising accumulation across the
    #    'arbitrary' axis and the clamped-duplicate skip).
    kx3, kt3 = jax.random.split(jax.random.PRNGKey(3))
    x3 = jax.random.normal(kx3, (300, 128), dtype=jnp.float32)
    t3 = (jax.random.uniform(kt3, (300, 128)) > 0.6).astype(jnp.float32)
    for red in ("mean", "sum"):
        check(x3, t3, t3, 0.1, red, max_block_rows=64)

    # 4) Ragged shape: boundary mask + <128-element plain-JAX tail.
    kx2, kt2 = jax.random.split(jax.random.PRNGKey(1))
    x2 = jax.random.normal(kx2, (3, 5, 7, 11), dtype=jnp.float32)
    t2 = (jax.random.uniform(kt2, (3, 5, 7, 11)) > 0.6).astype(jnp.float32)
    for red in ("mean", "sum"):
        check(x2, t2, t2, 0.1, red)

    print("KERNEL_OK")
</pallas_src>

<mosaic_0001>
module attributes {stable_mosaic.version = 11 : i64} {
  func.func @_an_loss_kernel(%arg0: i32, %arg1: i32, %arg2: memref<64x128xf32, #tpu.memory_space<vmem>>, %arg3: memref<64x128xf32, #tpu.memory_space<vmem>>, %arg4: memref<1x64x128xf32, #tpu.memory_space<vmem>>) attributes {dimension_semantics = [#tpu.dimension_semantics<parallel>, #tpu.dimension_semantics<arbitrary>], iteration_bounds = array<i64: 1, 1>, scalar_prefetch = 0 : i64, scratch_operands = 0 : i64, tpu.core_type = #tpu.core_type<tc>, window_params = [{transform_indices = @transform_0, window_bounds = array<i64: 64, 128>}, {transform_indices = @transform_1, window_bounds = array<i64: 64, 128>}, {transform_indices = @transform_2, window_bounds = array<i64: 1, 64, 128>}]} {
    %c0_i32 = arith.constant 0 : i32
    %0 = arith.cmpi eq, %arg1, %c0_i32 : i32
    %1 = arith.extui %0 : i1 to i32
    %c0_i32_0 = arith.constant 0 : i32
    %2 = arith.cmpi ne, %1, %c0_i32_0 : i32
    scf.if %2 {
      %cst_8 = arith.constant 0.000000e+00 : f32
      %16 = vector.broadcast %cst_8 : f32 to vector<1x64x128xf32>
      %c0 = arith.constant 0 : index
      %c0_9 = arith.constant 0 : index
      %c0_10 = arith.constant 0 : index
      %17 = vector.load %arg4[%c0, %c0_9, %c0_10] : memref<1x64x128xf32, #tpu.memory_space<vmem>>, vector<1x64x128xf32>
      tpu.vector_store %arg4[%c0, %c0_9, %c0_10], %16 {strides = array<i32>} : memref<1x64x128xf32, #tpu.memory_space<vmem>>, vector<1x64x128xf32>,
    } else {
    }
    %c1_i32 = arith.constant 1 : i32
    %3 = arith.muli %arg0, %c1_i32 : i32
    %4 = arith.addi %3, %arg1 : i32
    %c64_i32 = arith.constant 64 : i32
    %5 = arith.muli %4, %c64_i32 : i32
    %c64_i32_1 = arith.constant 64 : i32
    %6 = arith.addi %5, %c64_i32_1 : i32
    %c16_i32 = arith.constant 16 : i32
    %7 = arith.cmpi sle, %6, %c16_i32 : i32
    %8 = arith.extui %7 : i1 to i32
    %cst = arith.constant 0.899999976 : f32
    %c0_i32_2 = arith.constant 0 : i32
    %9 = arith.cmpi ne, %8, %c0_i32_2 : i32
    scf.if %9 {
      %c0 = arith.constant 0 : index
      %c0_8 = arith.constant 0 : index
      %16 = vector.load %arg2[%c0, %c0_8] : memref<64x128xf32, #tpu.memory_space<vmem>>, vector<64x128xf32>
      %c0_9 = arith.constant 0 : index
      %c0_10 = arith.constant 0 : index
      %17 = vector.load %arg3[%c0_9, %c0_10] : memref<64x128xf32, #tpu.memory_space<vmem>>, vector<64x128xf32>
      %cst_11 = arith.constant 1.000000e+00 : f32
      %18 = vector.broadcast %cst_11 : f32 to vector<64x128xf32>
      %19 = arith.cmpf oeq, %17, %18 : vector<64x128xf32>
      %cst_12 = arith.constant 0.000000e+00 : f32
      %20 = vector.broadcast %cst_12 : f32 to vector<64x128xf32>
      %21 = arith.subf %20, %16 : vector<64x128xf32>
      %22 = arith.minimumf %16, %21 : vector<64x128xf32>
      %23 = math.exp %22 : vector<64x128xf32>
      %24 = math.log1p %23 : vector<64x128xf32>
      %25 = arith.select %19, %16, %21 : vector<64x128xi1>, vector<64x128xf32>
      %cst_13 = arith.constant 0.000000e+00 : f32
      %26 = vector.broadcast %cst_13 : f32 to vector<64x128xf32>
      %27 = arith.maximumf %25, %26 : vector<64x128xf32>
      %28 = vector.broadcast %cst : f32 to vector<64x128xf32>
      %29 = arith.mulf %25, %28 : vector<64x128xf32>
      %30 = arith.subf %27, %29 : vector<64x128xf32>
      %31 = arith.addf %30, %24 : vector<64x128xf32>
      %32 = vector.shape_cast %31 : vector<64x128xf32> to vector<1x64x128xf32>
      %cst_14 = arith.constant dense<0.000000e+00> : vector<64x128xf32>
      %33 = vector.multi_reduction <add>, %32, %cst_14 [0] : vector<1x64x128xf32> to vector<64x128xf32>
      %c0_15 = arith.constant 0 : index
      %c0_16 = arith.constant 0 : index
      %c0_17 = arith.constant 0 : index
      %34 = vector.load %arg4[%c0_15, %c0_16, %c0_17] : memref<1x64x128xf32, #tpu.memory_space<vmem>>, vector<1x64x128xf32>
      %35 = vector.shape_cast %33 : vector<64x128xf32> to vector<1x64x128xf32>
      %36 = arith.addf %34, %35 : vector<1x64x128xf32>
      %c0_18 = arith.constant 0 : index
      %c0_19 = arith.constant 0 : index
      %c0_20 = arith.constant 0 : index
      %37 = vector.load %arg4[%c0_18, %c0_19, %c0_20] : memref<1x64x128xf32, #tpu.memory_space<vmem>>, vector<1x64x128xf32>
      tpu.vector_store %arg4[%c0_18, %c0_19, %c0_20], %36 {strides = array<i32>} : memref<1x64x128xf32, #tpu.memory_space<vmem>>, vector<1x64x128xf32>,
    } else {
    }
    %c16_i32_3 = arith.constant 16 : i32
    %10 = arith.cmpi slt, %5, %c16_i32_3 : i32
    %c64_i32_4 = arith.constant 64 : i32
    %11 = arith.addi %5, %c64_i32_4 : i32
    %c16_i32_5 = arith.constant 16 : i32
    %12 = arith.cmpi sgt, %11, %c16_i32_5 : i32
    %13 = arith.andi %10, %12 : i1
    %14 = arith.extui %13 : i1 to i32
    %cst_6 = arith.constant 0.899999976 : f32
    %c0_i32_7 = arith.constant 0 : i32
    %15 = arith.cmpi ne, %14, %c0_i32_7 : i32
    scf.if %15 {
      %c0 = arith.constant 0 : index
      %c0_8 = arith.constant 0 : index
      %16 = vector.load %arg2[%c0, %c0_8] : memref<64x128xf32, #tpu.memory_space<vmem>>, vector<64x128xf32>
      %c0_9 = arith.constant 0 : index
      %c0_10 = arith.constant 0 : index
      %17 = vector.load %arg3[%c0_9, %c0_10] : memref<64x128xf32, #tpu.memory_space<vmem>>, vector<64x128xf32>
      %cst_11 = arith.constant 1.000000e+00 : f32
      %18 = vector.broadcast %cst_11 : f32 to vector<64x128xf32>
      %19 = arith.cmpf oeq, %17, %18 : vector<64x128xf32>
      %cst_12 = arith.constant 0.000000e+00 : f32
      %20 = vector.broadcast %cst_12 : f32 to vector<64x128xf32>
      %21 = arith.subf %20, %16 : vector<64x128xf32>
      %22 = arith.minimumf %16, %21 : vector<64x128xf32>
      %23 = math.exp %22 : vector<64x128xf32>
      %24 = math.log1p %23 : vector<64x128xf32>
      %25 = arith.select %19, %16, %21 : vector<64x128xi1>, vector<64x128xf32>
      %cst_13 = arith.constant 0.000000e+00 : f32
      %26 = vector.broadcast %cst_13 : f32 to vector<64x128xf32>
      %27 = arith.maximumf %25, %26 : vector<64x128xf32>
      %28 = vector.broadcast %cst_6 : f32 to vector<64x128xf32>
      %29 = arith.mulf %25, %28 : vector<64x128xf32>
      %30 = arith.subf %27, %29 : vector<64x128xf32>
      %31 = arith.addf %30, %24 : vector<64x128xf32>
      %32 = tpu.iota {dimensions = array<i32: 0>} : vector<64x128xi32>
      %33 = vector.broadcast %5 : i32 to vector<64x128xi32>
      %34 = arith.addi %32, %33 : vector<64x128xi32>
      %c16_i32_14 = arith.constant 16 : i32
      %35 = vector.broadcast %c16_i32_14 : i32 to vector<64x128xi32>
      %36 = arith.cmpi slt, %34, %35 : vector<64x128xi32>
      %cst_15 = arith.constant 0.000000e+00 : f32
      %37 = vector.broadcast %cst_15 : f32 to vector<64x128xf32>
      %38 = arith.select %36, %31, %37 : vector<64x128xi1>, vector<64x128xf32>
      %39 = vector.shape_cast %38 : vector<64x128xf32> to vector<1x64x128xf32>
      %cst_16 = arith.constant dense<0.000000e+00> : vector<64x128xf32>
      %40 = vector.multi_reduction <add>, %39, %cst_16 [0] : vector<1x64x128xf32> to vector<64x128xf32>
      %c0_17 = arith.constant 0 : index
      %c0_18 = arith.constant 0 : index
      %c0_19 = arith.constant 0 : index
      %41 = vector.load %arg4[%c0_17, %c0_18, %c0_19] : memref<1x64x128xf32, #tpu.memory_space<vmem>>, vector<1x64x128xf32>
      %42 = vector.shape_cast %40 : vector<64x128xf32> to vector<1x64x128xf32>
      %43 = arith.addf %41, %42 : vector<1x64x128xf32>
      %c0_20 = arith.constant 0 : index
      %c0_21 = arith.constant 0 : index
      %c0_22 = arith.constant 0 : index
      %44 = vector.load %arg4[%c0_20, %c0_21, %c0_22] : memref<1x64x128xf32, #tpu.memory_space<vmem>>, vector<1x64x128xf32>
      tpu.vector_store %arg4[%c0_20, %c0_21, %c0_22], %43 {strides = array<i32>} : memref<1x64x128xf32, #tpu.memory_space<vmem>>, vector<1x64x128xf32>,
    } else {
    }
    return
  }
  func.func @transform_0(%arg0: i32, %arg1: i32) -> (i32, i32) {
    %c1_i32 = arith.constant 1 : i32
    %0 = arith.muli %arg0, %c1_i32 : i32
    %1 = arith.addi %0, %arg1 : i32
    %c0_i32 = arith.constant 0 : i32
    %2 = arith.minsi %1, %c0_i32 : i32
    %c0_i32_0 = arith.constant 0 : i32
    %c0_i32_1 = arith.constant 0 : i32
    return %2, %c0_i32_0 : i32, i32
  }
  func.func @transform_1(%arg0: i32, %arg1: i32) -> (i32, i32) {
    %c1_i32 = arith.constant 1 : i32
    %0 = arith.muli %arg0, %c1_i32 : i32
    %1 = arith.addi %0, %arg1 : i32
    %c0_i32 = arith.constant 0 : i32
    %2 = arith.minsi %1, %c0_i32 : i32
    %c0_i32_0 = arith.constant 0 : i32
    %c0_i32_1 = arith.constant 0 : i32
    return %2, %c0_i32_0 : i32, i32
  }
  func.func @transform_2(%arg0: i32, %arg1: i32) -> (i32, i32, i32) {
    %c0_i32 = arith.constant 0 : i32
    %c0_i32_0 = arith.constant 0 : i32
    %c0_i32_1 = arith.constant 0 : i32
    return %arg0, %c0_i32, %c0_i32_0 : i32, i32, i32
  }
}

</mosaic_0001>

<bundles_post_ra>
// kernel: tpu_custom_call.1
= control target key start
LH: loop header
LB: loop body
LE: loop exit
PB: predicated region body
PF: predicated region fallthrough
CT: control target
= control target key end

     0   :  { %7 = vsyncpa [#allocation3], 0  ;;  %s692_s0 = inlined_call_operand.hbm [shape: f32[16,128], index: 0, kind: input, shape index: {}]   ;;  %s693_s1 = inlined_call_operand.hbm [shape: f32[16,128], index: 1, kind: input, shape index: {}]   ;;  %s694_s2 = inlined_call_operand.hbm [shape: f32[1,64,128], index: 2, kind: output, shape index: {}]  }
   0x1   :  { %8 = vsyncpa [#allocation6], 0 }
   0x2   :  { %9 = vsyncpa [#allocation4], 0 }
   0x3   :  { %20 = vsyncadd [#allocation3], 768  ;;  %s25_s11 = sshll.u32 %s692_s0, 4  ;;  %s653_s12 = smov [#allocation2]   ;;  %s26_s11 = int_to_ptr.hbm [resolvable:$true] %s25_s11 }
   0x4   :  { %s27_s13 = sshll.u32 %s653_s12, 4  ;;  %s654_s14 = smov 128   ;;  %s28_s13 = int_to_ptr.vmem [resolvable:$true] %s27_s13 }
   0x5   :  { %s655_s15 = smov 8  }
   0x6   :  { %33 = dma.hbm_to_vmem [thread:$0]  %s26_s11, 256, %s28_s13, [#allocation3], %s654_s14, %s654_s14, %s655_s15  }
   0x7   :  { %44 = vsyncadd [#allocation6], 768  ;;  %s49_s18 = sshll.u32 %s693_s1, 4  ;;  %s656_s19 = smov [#allocation5]   ;;  %s50_s18 = int_to_ptr.hbm [resolvable:$true] %s49_s18 }
   0x8   :  { %s51_s20 = sshll.u32 %s656_s19, 4  ;;  %s52_s20 = int_to_ptr.vmem [resolvable:$true] %s51_s20 }
   0x9   :  { %57 = dma.hbm_to_vmem [thread:$0]  %s50_s18, 256, %s52_s20, [#allocation6], %s654_s14, %s654_s14, %s655_s15  }
   0xa   :  { %647 = dma.done.wait [#allocation3], 1024  }
   0xb   :  { %648 = vsyncadd [#allocation3], 4294966272 }
   0xc   :  { %649 = dma.done.wait [#allocation6], 1024  }
   0xd   :  { %650 = vsyncadd [#allocation6], 4294966272  ;;  %v657_v0 = vmov 0.0   ;;  %v303_v1 = vld [vmem:[#allocation2] sm:$0xff]  ;;  %v304_v2 = vld [vmem:[#allocation2 + $0x8] sm:$0xff]  ;;  %s658_s0 = smov [#allocation7]  }
   0xe   :  { %531 = vst [vmem:[#allocation7 + $0x10] sm:$0xff] %v657_v0  ;;  %v327_v3 = vsub.f32 0.0, %v303_v1  ;;  %v328_v4 = vsub.f32 0.0, %v304_v2  ;;  %v311_v9 = vld [vmem:[#allocation5] sm:$0xff]  ;;  %v312_v10 = vld [vmem:[#allocation5 + $0x8] sm:$0xff]  ;;  %s541_s1 = sshll.u32 %s658_s0, 4  ;;  %s542_s1 = int_to_ptr.vmem [resolvable:$true] %s541_s1 }
   0xf   :  { %532 = vst [vmem:[#allocation7 + $0x18] sm:$0xff] %v657_v0  ;;  %vm319_vm0 = vcmp.eq.f32.partialorder %v311_v9, 1.0  ;;  %vm320_vm1 = vcmp.eq.f32.partialorder %v312_v10, 1.0  ;;  %s543_s23 = sshll.u32 %s694_s2, 4  ;;  %s544_s23 = int_to_ptr.hbm [resolvable:$true] %s543_s23 }
  0x10   :  { %533 = vst [vmem:[#allocation7 + $0x20] sm:$0xff] %v657_v0  ;;  %v335_v5 = vmin.f32 %v303_v1, %v327_v3  ;;  %v336_v6 = vmin.f32 %v304_v2, %v328_v4  ;;  %v431_v15 = vsel %vm319_vm0, %v303_v1, %v327_v3  ;;  %v432_v18 = vsel %vm320_vm1, %v304_v2, %v328_v4 }
  0x11   :  { %534 = vst [vmem:[#allocation7 + $0x28] sm:$0xff] %v657_v0  ;;  %v439_v21 = vmax.f32 %v431_v15, 0.0  ;;  %v447_v22 = vmul.f32 0.9, %v431_v15  ;;  %v440_v25 = vmax.f32 %v432_v18, 0.0 }
  0x12   :  { %535 = vst [vmem:[#allocation7 + $0x30] sm:$0xff] %v657_v0  ;;  %v343_v7 = vmul.f32 1.442695, %v335_v5  ;;  %v345_v8 = vmul.f32 1.442695, %v336_v6 }
  0x13   :  { %536 = vst [vmem:[#allocation7 + $0x38] sm:$0xff] %v657_v0  ;;  %v448_v26 = vmul.f32 0.9, %v432_v18  ;;  %v455_v29 = vsub.f32 %v439_v21, %v447_v22 }
  0x14   :  { %567 = vpow2.f32 %v343_v7 }
  0x15   :  { %569 = vpow2.f32 %v345_v8  ;;  %v456_v33 = vsub.f32 %v440_v25, %v448_v26 }
  0x1a   :  { %v568_v11 = vpop.eup %567 }
  0x1b   :  { %v570_v12 = vpop.eup %569  ;;  %v359_v13 = vadd.f32 1.0, %v568_v11  ;;  %v362_v14 = vmul.f32 -0.5, %v568_v11  ;;  %v365_v20 = vand.u32 2147483647, %v568_v11 }
  0x1c   :  { %v368_v16 = vadd.f32 1.0, %v570_v12  ;;  %v371_v17 = vmul.f32 -0.5, %v570_v12  ;;  %v374_v24 = vand.u32 2147483647, %v570_v12 }
  0x1d   :  { %571 = vlog2.f32 %v359_v13  ;;  %v363_v19 = vadd.f32 1.0, %v362_v14  ;;  %vm366_vm2 = vcmp.lt.f32.partialorder %v365_v20, 0.0004427343 }
  0x1e   :  { %573 = vlog2.f32 %v368_v16  ;;  %v372_v23 = vadd.f32 1.0, %v371_v17  ;;  %vm375_vm3 = vcmp.lt.f32.partialorder %v374_v24, 0.0004427343 }
  0x1f   :  { %v364_v27 = vmul.f32 %v568_v11, %v363_v19 }
  0x20   :  { %v373_v30 = vmul.f32 %v570_v12, %v372_v23 }
  0x23   :  { %v572_v28 = vpop.eup %571 }
  0x24   :  { %v574_v31 = vpop.eup %573  ;;  %v361_v32 = vmul.f32 0.6931472, %v572_v28 }
  0x25   :  { %v370_v34 = vmul.f32 0.6931472, %v574_v31 }
  0x26   :  { %v367_v35 = vsel %vm366_vm2, %v364_v27, %v361_v32 }
  0x27   :  { %v463_v36 = vadd.f32 %v455_v29, %v367_v35  ;;  %v376_v37 = vsel %vm375_vm3, %v373_v30, %v370_v34 }
  0x28   :  { %v464_v38 = vadd.f32 %v456_v33, %v376_v37 }
  0x29   :  { %529 = vst [vmem:[#allocation7] sm:$0xff] %v463_v36 }
  0x2a   :  { %530 = vst [vmem:[#allocation7 + $0x8] sm:$0xff] %v464_v38 }
  0x2b   :  { %549 = dma.vmem_to_hbm [thread:$0]  %s542_s1, 1024, %s544_s23, [#allocation4], %s654_s14, %s654_s14, %s655_s15  }
  0x2c   :  { %651 = dma.done.wait [#allocation4], 1024  }
  0x2d   :  { %652 = vsyncadd [#allocation4], 4294966272 }
  0x2e   :  { %554 = vsyncpa [#allocation3], 1 }
  0x2f   :  { %555 = vsyncpa [#allocation6], 1 }
  0x30   :  { %556 = vsyncpa [#allocation4], 1 }

</bundles_post_ra>
